<compile_context>
chip_gen: v5e
topology: v5e:2x2
jax: 0.10.0
libtpu: 0.0.40
codegen_flags: <defaults>
</compile_context>

<pallas_src>
import functools

import jax
import jax.numpy as jnp
from jax.experimental import pallas as pl
from jax.experimental.pallas import tpu as pltpu

F_PAD = 128     # lane-dense padded width for hidden / action dims
HIDDEN = 32


def _round_up(x, m):
    return ((x + m - 1) // m) * m


def dqn_kernel(x_ref, w1_ref, w23_ref, b_ref, out_ref):
    # x_ref:   (TB, n_obs_pad)       f32  (natural feature width, 8-aligned)
    # w1_ref:  (n_obs_pad, 128)      bf16 (layer1 weight, cols padded to 128)
    # w23_ref: (2, 128, 128)         bf16 (layer2 | layer3, zero-padded)
    # b_ref:   (3, 1, 128)           f32  (b1 | b2 | b3, zero-padded)
    # out_ref: (TB, 128)             f32  (only first n_actions lanes meaningful)
    x = x_ref[...].astype(jnp.bfloat16)

    # layer1: Linear(n_obs, 32) + ReLU (bf16 operands, f32 accumulate/epilogue)
    h = jnp.dot(x, w1_ref[...], preferred_element_type=jnp.float32)
    h = jnp.maximum(h + b_ref[0], 0.0)

    # layer2: Linear(32, 32) + ReLU
    h = jnp.dot(h.astype(jnp.bfloat16), w23_ref[0], preferred_element_type=jnp.float32)
    h = jnp.maximum(h + b_ref[1], 0.0)

    # layer3: Linear(32, n_actions), no activation; lane-dense 128-wide store
    h = jnp.dot(h.astype(jnp.bfloat16), w23_ref[1], preferred_element_type=jnp.float32)
    out_ref[...] = (h + b_ref[2]).astype(out_ref.dtype)


def _choose_tb(batch):
    """Batch tile: big enough to hide DMA behind compute, multiple of 8, <=512."""
    return min(512, _round_up(batch, 8))


@functools.partial(jax.jit, static_argnums=(4,))
def dqn_forward(x, w1_packed, w23_packed, b_packed, n_actions):
    batch, n_obs = x.shape
    n_obs_pad = w1_packed.shape[0]
    assert n_obs <= n_obs_pad and n_actions <= F_PAD, "feature dims must fit the packed params"

    tb = _choose_tb(batch)
    padded_batch = _round_up(batch, tb)

    # Pad only when needed (static shape check => no-op for aligned inputs).
    if padded_batch != batch or n_obs_pad != n_obs:
        x = jnp.pad(x, ((0, padded_batch - batch), (0, n_obs_pad - n_obs)))

    grid = (padded_batch // tb,)

    flops = 2 * padded_batch * (n_obs_pad * F_PAD + 2 * F_PAD * F_PAD)
    bytes_accessed = (padded_batch * n_obs_pad * 4            # x  (f32)
                      + (n_obs_pad + 2 * F_PAD) * F_PAD * 2   # W  (bf16)
                      + 3 * F_PAD * 4                         # B  (f32)
                      + padded_batch * F_PAD * 4)             # out (f32)

    out = pl.pallas_call(
        dqn_kernel,
        out_shape=jax.ShapeDtypeStruct((padded_batch, F_PAD), jnp.float32),
        grid=grid,
        in_specs=[
            pl.BlockSpec((tb, n_obs_pad), lambda i: (i, 0)),          # x tile per step
            pl.BlockSpec((n_obs_pad, F_PAD), lambda i: (0, 0)),       # w1, grid-invariant
            pl.BlockSpec((2, F_PAD, F_PAD), lambda i: (0, 0, 0)),     # w2|w3, grid-invariant
            pl.BlockSpec((3, 1, F_PAD), lambda i: (0, 0, 0)),         # biases, grid-invariant
        ],
        out_specs=pl.BlockSpec((tb, F_PAD), lambda i: (i, 0)),
        compiler_params=pltpu.CompilerParams(
            dimension_semantics=("parallel",)),                       # megacore split on v7x
        cost_estimate=pl.CostEstimate(
            flops=flops, bytes_accessed=bytes_accessed, transcendentals=0),
    )(x, w1_packed, w23_packed, b_packed)

    return out[:batch, :n_actions]


def init_dqn_params(key, n_observations, n_actions, hidden=HIDDEN):
    """Deterministic init mimicking PyTorch nn.Linear default U[-1/sqrt(fan_in), +...]."""
    ks = jax.random.split(key, 6)

    def linear(kw, kb, fan_in, fan_out):
        bound = 1.0 / jnp.sqrt(jnp.float32(fan_in))
        w = jax.random.uniform(kw, (fan_in, fan_out), jnp.float32, -bound, bound)  # (in, out)
        b = jax.random.uniform(kb, (fan_out,), jnp.float32, -bound, bound)
        return w, b

    w1, b1 = linear(ks[0], ks[1], n_observations, hidden)
    w2, b2 = linear(ks[2], ks[3], hidden, hidden)
    w3, b3 = linear(ks[4], ks[5], hidden, n_actions)
    return (w1, b1, w2, b2, w3, b3)


def pack_dqn_params(params):
    """Pack module params into three kernel operands:
       w1 (n_obs_pad, 128) bf16, w2|w3 stacked (2, 128, 128) bf16, biases (3, 1, 128) f32."""
    w1, b1, w2, b2, w3, b3 = params
    n_obs = w1.shape[0]
    n_obs_pad = max(8, _round_up(n_obs, 8))

    w1p = (jnp.zeros((n_obs_pad, F_PAD), jnp.float32)
           .at[:n_obs, : w1.shape[1]].set(w1)).astype(jnp.bfloat16)

    def pad_w(w):
        out = jnp.zeros((F_PAD, F_PAD), jnp.float32)
        return out.at[: w.shape[0], : w.shape[1]].set(w)

    def pad_b(bv):
        return jnp.zeros((1, F_PAD), jnp.float32).at[0, : bv.shape[0]].set(bv)

    w23 = jnp.stack([pad_w(w2), pad_w(w3)]).astype(jnp.bfloat16)
    b_packed = jnp.stack([pad_b(b1), pad_b(b2), pad_b(b3)])  # f32
    return w1p, w23, b_packed


def dqn_reference_f32(x, params):
    """Pure-JAX f32 reference (exact PyTorch module semantics)."""
    w1, b1, w2, b2, w3, b3 = params
    h = jnp.maximum(x @ w1 + b1, 0.0)
    h = jnp.maximum(h @ w2 + b2, 0.0)
    return h @ w3 + b3


def dqn_reference_bf16(x, params):
    """Pure-JAX reference with the same operand precision as the kernel
    (bf16 matmul operands, f32 accumulate / bias / ReLU)."""
    w1, b1, w2, b2, w3, b3 = params
    bf = jnp.bfloat16
    dot = lambda a, w: jnp.dot(a.astype(bf), w.astype(bf),
                               preferred_element_type=jnp.float32)
    h = jnp.maximum(dot(x, w1) + b1, 0.0)
    h = jnp.maximum(dot(h, w2) + b2, 0.0)
    return dot(h, w3) + b3


def _check(out, x, params, tag):
    assert jnp.allclose(out, dqn_reference_bf16(x, params), atol=1e-2, rtol=1e-2), \
        f"mismatch vs bf16-matched reference ({tag})"
    assert jnp.allclose(out, dqn_reference_f32(x, params), atol=5e-2, rtol=5e-2), \
        f"mismatch vs f32 reference ({tag})"


if __name__ == "__main__":
    n_observations = 16
    n_actions = 4

    key = jax.random.PRNGKey(0)
    kx, kx2, kx3, kp = jax.random.split(key, 4)
    params = init_dqn_params(kp, n_observations, n_actions)
    w1p, w23, b_packed = pack_dqn_params(params)

    # Small inference-style batch (single grid step, no padding needed).
    x_small = jax.random.normal(kx, (8, n_observations), jnp.float32)
    out_small = jax.block_until_ready(dqn_forward(x_small, w1p, w23, b_packed, n_actions))
    assert out_small.shape == (8, n_actions)
    _check(out_small, x_small, params, "small batch")

    # Replay-buffer-sized batch, not a multiple of 8 (exercises batch padding).
    x_mid = jax.random.normal(kx2, (300, n_observations), jnp.float32)
    out_mid = jax.block_until_ready(dqn_forward(x_mid, w1p, w23, b_packed, n_actions))
    assert out_mid.shape == (300, n_actions)
    _check(out_mid, x_mid, params, "mid batch")

    # Larger batch that spans multiple grid steps (exercises the pipelined path).
    x_big = jax.random.normal(kx3, (600, n_observations), jnp.float32)
    out_big = jax.block_until_ready(dqn_forward(x_big, w1p, w23, b_packed, n_actions))
    assert out_big.shape == (600, n_actions)
    _check(out_big, x_big, params, "big batch")

    print("KERNEL_OK")
</pallas_src>

<mosaic_0001>
module attributes {stable_mosaic.version = 11 : i64} {
  func.func @dqn_kernel(%arg0: i32, %arg1: memref<8x16xf32, #tpu.memory_space<vmem>>, %arg2: memref<16x128xbf16, #tpu.memory_space<vmem>>, %arg3: memref<2x128x128xbf16, #tpu.memory_space<vmem>>, %arg4: memref<3x1x128xf32, #tpu.memory_space<vmem>>, %arg5: memref<8x128xf32, #tpu.memory_space<vmem>>) attributes {dimension_semantics = [#tpu.dimension_semantics<parallel>], iteration_bounds = array<i64: 1>, scalar_prefetch = 0 : i64, scratch_operands = 0 : i64, tpu.core_type = #tpu.core_type<tc>, window_params = [{transform_indices = @transform_0, window_bounds = array<i64: 8, 16>}, {pipeline_mode = #tpu.pipeline_mode<synchronous>, transform_indices = @transform_1, window_bounds = array<i64: 16, 128>}, {pipeline_mode = #tpu.pipeline_mode<synchronous>, transform_indices = @transform_2, window_bounds = array<i64: 2, 128, 128>}, {pipeline_mode = #tpu.pipeline_mode<synchronous>, transform_indices = @transform_3, window_bounds = array<i64: 3, 1, 128>}, {transform_indices = @transform_4, window_bounds = array<i64: 8, 128>}]} {
    %c0 = arith.constant 0 : index
    %c0_0 = arith.constant 0 : index
    %0 = vector.load %arg1[%c0, %c0_0] : memref<8x16xf32, #tpu.memory_space<vmem>>, vector<8x16xf32>
    %1 = arith.truncf %0 : vector<8x16xf32> to vector<8x16xbf16>
    %c0_1 = arith.constant 0 : index
    %c0_2 = arith.constant 0 : index
    %2 = vector.load %arg2[%c0_1, %c0_2] : memref<16x128xbf16, #tpu.memory_space<vmem>>, vector<16x128xbf16>
    %cst = arith.constant dense<0.000000e+00> : vector<8x128xf32>
    %3 = tpu.matmul %1, %2, %cst {dimension_numbers = #tpu.dot_dimension_numbers<[1], [0], [0], [1], [0, 0, 1, 1], [], []>} : vector<8x16xbf16>, vector<16x128xbf16>, vector<8x128xf32> -> vector<8x128xf32>
    %c0_3 = arith.constant 0 : index
    %c0_4 = arith.constant 0 : index
    %c0_5 = arith.constant 0 : index
    %4 = vector.load %arg4[%c0_3, %c0_4, %c0_5] : memref<3x1x128xf32, #tpu.memory_space<vmem>>, vector<1x1x128xf32>
    %5 = vector.shape_cast %4 : vector<1x1x128xf32> to vector<1x128xf32>
    %6 = vector.broadcast %5 : vector<1x128xf32> to vector<8x128xf32>
    %7 = arith.addf %3, %6 : vector<8x128xf32>
    %cst_6 = arith.constant 0.000000e+00 : f32
    %8 = vector.broadcast %cst_6 : f32 to vector<8x128xf32>
    %9 = arith.maximumf %7, %8 : vector<8x128xf32>
    %10 = arith.truncf %9 : vector<8x128xf32> to vector<8x128xbf16>
    %c0_7 = arith.constant 0 : index
    %c0_8 = arith.constant 0 : index
    %c0_9 = arith.constant 0 : index
    %11 = vector.load %arg3[%c0_7, %c0_8, %c0_9] : memref<2x128x128xbf16, #tpu.memory_space<vmem>>, vector<1x128x128xbf16>
    %12 = vector.shape_cast %11 : vector<1x128x128xbf16> to vector<128x128xbf16>
    %cst_10 = arith.constant dense<0.000000e+00> : vector<8x128xf32>
    %13 = tpu.matmul %10, %12, %cst_10 {dimension_numbers = #tpu.dot_dimension_numbers<[1], [0], [0], [1], [0, 0, 1, 1], [], []>} : vector<8x128xbf16>, vector<128x128xbf16>, vector<8x128xf32> -> vector<8x128xf32>
    %c1 = arith.constant 1 : index
    %c0_11 = arith.constant 0 : index
    %c0_12 = arith.constant 0 : index
    %14 = vector.load %arg4[%c1, %c0_11, %c0_12] : memref<3x1x128xf32, #tpu.memory_space<vmem>>, vector<1x1x128xf32>
    %15 = vector.shape_cast %14 : vector<1x1x128xf32> to vector<1x128xf32>
    %16 = vector.broadcast %15 : vector<1x128xf32> to vector<8x128xf32>
    %17 = arith.addf %13, %16 : vector<8x128xf32>
    %cst_13 = arith.constant 0.000000e+00 : f32
    %18 = vector.broadcast %cst_13 : f32 to vector<8x128xf32>
    %19 = arith.maximumf %17, %18 : vector<8x128xf32>
    %20 = arith.truncf %19 : vector<8x128xf32> to vector<8x128xbf16>
    %c1_14 = arith.constant 1 : index
    %c0_15 = arith.constant 0 : index
    %c0_16 = arith.constant 0 : index
    %21 = vector.load %arg3[%c1_14, %c0_15, %c0_16] : memref<2x128x128xbf16, #tpu.memory_space<vmem>>, vector<1x128x128xbf16>
    %22 = vector.shape_cast %21 : vector<1x128x128xbf16> to vector<128x128xbf16>
    %cst_17 = arith.constant dense<0.000000e+00> : vector<8x128xf32>
    %23 = tpu.matmul %20, %22, %cst_17 {dimension_numbers = #tpu.dot_dimension_numbers<[1], [0], [0], [1], [0, 0, 1, 1], [], []>} : vector<8x128xbf16>, vector<128x128xbf16>, vector<8x128xf32> -> vector<8x128xf32>
    %c2 = arith.constant 2 : index
    %c0_18 = arith.constant 0 : index
    %c0_19 = arith.constant 0 : index
    %24 = vector.load %arg4[%c2, %c0_18, %c0_19] : memref<3x1x128xf32, #tpu.memory_space<vmem>>, vector<1x1x128xf32>
    %25 = vector.shape_cast %24 : vector<1x1x128xf32> to vector<1x128xf32>
    %26 = vector.broadcast %25 : vector<1x128xf32> to vector<8x128xf32>
    %27 = arith.addf %23, %26 : vector<8x128xf32>
    %c0_20 = arith.constant 0 : index
    %c0_21 = arith.constant 0 : index
    %28 = vector.load %arg5[%c0_20, %c0_21] : memref<8x128xf32, #tpu.memory_space<vmem>>, vector<8x128xf32>
    tpu.vector_store %arg5[%c0_20, %c0_21], %27 {strides = array<i32>} : memref<8x128xf32, #tpu.memory_space<vmem>>, vector<8x128xf32>,
    return
  }
  func.func @transform_0(%arg0: i32) -> (i32, i32) {
    %c0_i32 = arith.constant 0 : i32
    %c0_i32_0 = arith.constant 0 : i32
    return %arg0, %c0_i32 : i32, i32
  }
  func.func @transform_1(%arg0: i32) -> (i32, i32) {
    %c0_i32 = arith.constant 0 : i32
    %c0_i32_0 = arith.constant 0 : i32
    %c0_i32_1 = arith.constant 0 : i32
    return %c0_i32, %c0_i32_0 : i32, i32
  }
  func.func @transform_2(%arg0: i32) -> (i32, i32, i32) {
    %c0_i32 = arith.constant 0 : i32
    %c0_i32_0 = arith.constant 0 : i32
    %c0_i32_1 = arith.constant 0 : i32
    %c0_i32_2 = arith.constant 0 : i32
    return %c0_i32, %c0_i32_0, %c0_i32_1 : i32, i32, i32
  }
  func.func @transform_3(%arg0: i32) -> (i32, i32, i32) {
    %c0_i32 = arith.constant 0 : i32
    %c0_i32_0 = arith.constant 0 : i32
    %c0_i32_1 = arith.constant 0 : i32
    %c0_i32_2 = arith.constant 0 : i32
    return %c0_i32, %c0_i32_0, %c0_i32_1 : i32, i32, i32
  }
  func.func @transform_4(%arg0: i32) -> (i32, i32) {
    %c0_i32 = arith.constant 0 : i32
    %c0_i32_0 = arith.constant 0 : i32
    return %arg0, %c0_i32 : i32, i32
  }
}

</mosaic_0001>

<bundles_post_ra>
// kernel: dqn_forward.1
= control target key start
LH: loop header
LB: loop body
LE: loop exit
PB: predicated region body
PF: predicated region fallthrough
CT: control target
= control target key end

     0   :  { %9 = vsyncpa [#allocation3], 0  ;;  %s534_s0 = inlined_call_operand.hbm [shape: f32[8,16], index: 0, kind: input, shape index: {}]   ;;  %s535_s1 = inlined_call_operand.hbm [shape: bf16[16,128], index: 1, kind: input, shape index: {}]   ;;  %s536_s2 = inlined_call_operand.hbm [shape: bf16[2,128,128], index: 2, kind: input, shape index: {}]   ;;  %s537_s3 = inlined_call_operand.hbm [shape: f32[3,1,128], index: 3, kind: input, shape index: {}]   ;;  %s538_s4 = inlined_call_operand.vmem [shape: f32[8,128], index: 4, kind: output, shape index: {}]  }
   0x1   :  { %10 = vsyncpa [#allocation5], 0  ;;  %s27_s17 = sshll.u32 %s535_s1, 4  ;;  %s28_s17 = int_to_ptr.hbm [resolvable:$true] %s27_s17 }
   0x2   :  { %11 = vsyncpa [#allocation8], 0  ;;  %s486_s18 = smov [#allocation4]   ;;  %s17_s22 = sshll.u32 %s534_s0, 4  ;;  %s18_s22 = int_to_ptr.hbm [resolvable:$true] %s17_s22 }
   0x3   :  { %s29_s19 = sshll.u32 %s486_s18, 4  ;;  %s487_s23 = smov 64   ;;  %s30_s19 = int_to_ptr.vmem [resolvable:$true] %s29_s19 }
   0x4   :  { %s488_s24 = smov 4   ;;  %s489_s25 = smov [#allocation2]  }
   0x5   :  { %35 = dma.hbm_to_vmem [thread:$0]  %s28_s17, 128, %s30_s19, [#allocation5], %s487_s23, %s487_s23, %s488_s24  }
   0x6   :  { %s19_s26 = sshll.u32 %s489_s25, 4  ;;  %s40_s29 = sshll.u32 %s536_s2, 4  ;;  %s20_s26 = int_to_ptr.vmem [resolvable:$true] %s19_s26  ;;  %s41_s29 = int_to_ptr.hbm [resolvable:$true] %s40_s29 }
   0x7   :  { %22 = dma.hbm_to_vmem [thread:$0]  %s18_s22, 128, %s20_s26, [#allocation3]  }
   0x8   :  { %s53_s5 = sshll.u32 %s537_s3, 4  ;;  %s490_s6 = smov [#allocation6]   ;;  %s54_s5 = int_to_ptr.hbm [resolvable:$true] %s53_s5 }
   0x9   :  { %s42_s7 = sshll.u32 %s490_s6, 4  ;;  %s491_s0 = smov [#allocation7]   ;;  %s43_s7 = int_to_ptr.vmem [resolvable:$true] %s42_s7 }
   0xa   :  { %48 = dma.hbm_to_vmem [thread:$0]  %s41_s29, 2048, %s43_s7, [#allocation5], %s487_s23, %s487_s23, %s488_s24  }
   0xb   :  { %s55_s8 = sshll.u32 %s491_s0, 4  ;;  %s492_s9 = smov 16   ;;  %s56_s8 = int_to_ptr.vmem [resolvable:$true] %s55_s8 }
   0xc   :  { %s493_s10 = smov 1  }
   0xd   :  { %61 = dma.hbm_to_vmem [thread:$0]  %s54_s5, 48, %s56_s8, [#allocation8], %s492_s9, %s492_s9, %s493_s10  }
   0xe   :  { %480 = dma.done.wait [#allocation3], 128  }
   0xf   :  { %481 = vsyncadd [#allocation3], 4294967168 }
  0x10   :  { %482 = dma.done.wait [#allocation5], 2176  }
  0x11   :  { %483 = vsyncadd [#allocation5], 4294965120 }
  0x12   :  { %484 = dma.done.wait [#allocation8], 48  }
  0x13   :  { %485 = vsyncadd [#allocation8], 4294967248  ;;  %v356_v0 = vld [vmem:[#allocation4] sm:$0xff]  ;;  %v79_v1 = vld [vmem:[#allocation2] sm:$0xff]  ;;  %vm93_vm0 = vcmask 130048  }
  0x14   :  { %v364_v2 = vld [vmem:[#allocation6 + $0x38] sm:$0xff]  ;;  %v80_v3 = vpack.c.bf16 %v79_v1, %v79_v1  ;;  %104 = vmatpush.bf16.msra.mxu0 %v356_v0  ;;  %v363_v4 = vld [vmem:[#allocation6 + $0x30] sm:$0xff]  ;;  %v362_v5 = vld [vmem:[#allocation6 + $0x28] sm:$0xff] }
  0x15   :  { %181 = vmatpush.bf16.msra.mxu1 %v364_v2  ;;  %v361_v6 = vld [vmem:[#allocation6 + $0x20] sm:$0xff]  ;;  %v360_v7 = vld [vmem:[#allocation6 + $0x18] sm:$0xff]  ;;  %v359_v8 = vld [vmem:[#allocation6 + $0x10] sm:$0xff] }
  0x16   :  { %v358_v9 = vld [vmem:[#allocation6 + $0x8] sm:$0xff]  ;;  %v357_v10 = vld [vmem:[#allocation6] sm:$0xff]  ;;  %v372_v11 = vld [vmem:[#allocation6 + $0x78] sm:$0xff] }
  0x17   :  { %291 = vmatmul.msk.bf16.vlgmr.msra.gmra.mxu0 %vm93_vm0, %v80_v3  ;;  %266 = vmatpush.bf16.msra.mxu2 %v372_v11  ;;  %v371_v12 = vld [vmem:[#allocation6 + $0x70] sm:$0xff]  ;;  %v370_v13 = vld [vmem:[#allocation6 + $0x68] sm:$0xff]  ;;  %v369_v14 = vld [vmem:[#allocation6 + $0x60] sm:$0xff] }
  0x18   :  { %v368_v15 = vld [vmem:[#allocation6 + $0x58] sm:$0xff]  ;;  %v367_v16 = vld [vmem:[#allocation6 + $0x50] sm:$0xff]  ;;  %v381_v17 = vld [vmem:[#allocation7] ss:$0 sm:$0xff] }
  0x19   :  { %182 = vmatpush.bf16.msra.mxu1 %v363_v4  ;;  %v366_v23 = vld [vmem:[#allocation6 + $0x48] sm:$0xff]  ;;  %v365_v24 = vld [vmem:[#allocation6 + $0x40] sm:$0xff] }
  0x1a   :  { %v382_v25 = vld [vmem:[#allocation7 + $0x1] ss:$0 sm:$0xff]  ;;  %v383_v31 = vld [vmem:[#allocation7 + $0x2] ss:$0 sm:$0xff] }
  0x1b   :  { %267 = vmatpush.bf16.msra.mxu2 %v371_v12 }
  0x1d   :  { %183 = vmatpush.bf16.msra.mxu1 %v362_v5 }
  0x1f   :  { %268 = vmatpush.bf16.msra.mxu2 %v370_v13 }
  0x21   :  { %184 = vmatpush.bf16.msra.mxu1 %v361_v6 }
  0x23   :  { %269 = vmatpush.bf16.msra.mxu2 %v369_v14 }
  0x25   :  { %185 = vmatpush.bf16.msra.mxu1 %v360_v7 }
  0x27   :  { %270 = vmatpush.bf16.msra.mxu2 %v368_v15 }
  0x29   :  { %186 = vmatpush.bf16.msra.mxu1 %v359_v8 }
  0x2b   :  { %271 = vmatpush.bf16.msra.mxu2 %v367_v16 }
  0x2d   :  { %187 = vmatpush.bf16.msra.mxu1 %v358_v9 }
  0x2f   :  { %272 = vmatpush.bf16.msra.mxu2 %v366_v23 }
  0x31   :  { %188 = vmatpush.bf16.msra.mxu1 %v357_v10 }
  0x33   :  { %273 = vmatpush.bf16.msra.mxu2 %v365_v24 }
  0x94   :  { %v106_v18 = vpop.f32.mrf.mxu0 }
  0x95   :  { %v107_v19 = vadd.f32 %v381_v17, %v106_v18 }
  0x97   :  { %v110_v20 = vmax.f32 %v107_v19, 0.0 }
  0x99   :  { %v111_v21 = vpack.c.bf16 %v110_v20, %v110_v20 }
  0x9b   :  { %189 = vmatmul.bf16.vlgmr.msra.gmra.mxu1 %v111_v21 }
  0x9c   :  { %v108_v22 = vpop.f32.mrf.mxu0 }
 0x118   :  { %v190_v26 = vpop.f32.mrf.mxu1 }
 0x119   :  { %v191_v27 = vadd.f32 %v382_v25, %v190_v26 }
 0x11b   :  { %v194_v28 = vmax.f32 %v191_v27, 0.0 }
 0x11d   :  { %v195_v29 = vpack.c.bf16 %v194_v28, %v194_v28 }
 0x11f   :  { %274 = vmatmul.bf16.vlgmr.msra.gmra.mxu2 %v195_v29 }
 0x120   :  { %v192_v30 = vpop.f32.mrf.mxu1 }
 0x1a2   :  { %v275_v32 = vpop.f32.mrf.mxu2 }
 0x1a3   :  { %v276_v33 = vadd.f32 %v383_v31, %v275_v32 }
 0x1a5   :  { %279 = vst [vmem:[%s538_s4] sm:$0xff] %v276_v33 }
 0x1aa   :  { %v277_v34 = vpop.f32.mrf.mxu2 }
 0x1ab   :  { %284 = vsyncpa [#allocation3], 1 }
 0x1ac   :  { %285 = vsyncpa [#allocation5], 1 }
 0x1ad   :  { %286 = vsyncpa [#allocation8], 1 }

</bundles_post_ra>
